<compile_context>
chip_gen: v6e
topology: v6e:2x2x1
jax: 0.10.0
libtpu: 0.0.40
codegen_flags: <defaults>
</compile_context>

<pallas_src>
import functools
import math

import jax
import jax.numpy as jnp
from jax import lax
from jax.experimental import pallas as pl
from jax.experimental.pallas import tpu as pltpu


_VMEM_LIMIT = 48 * 1024 * 1024  # safe on v5e/v6e (128 MiB) and v7x (64 MiB)


def _pick_tile(dim, target, align):
    """Largest power-of-two-ish tile <= target that divides dim and respects
    the (8,128) alignment; falls back to the full dimension."""
    if dim <= target:
        return dim
    t = target
    while t >= align:
        if dim % t == 0 and t % align == 0:
            return t
        t //= 2
    return dim


# ----------------------------------------------------------------------------
# Tiled, pipelined matmul (linear projections)
# ----------------------------------------------------------------------------
def _matmul_kernel(x_ref, w_ref, o_ref, acc_ref):
    @pl.when(pl.program_id(2) == 0)
    def _():
        acc_ref[...] = jnp.zeros_like(acc_ref)

    acc_ref[...] += jnp.dot(
        x_ref[...], w_ref[...], preferred_element_type=jnp.float32
    )

    @pl.when(pl.program_id(2) == pl.num_programs(2) - 1)
    def _():
        o_ref[...] = acc_ref[...].astype(o_ref.dtype)


def pallas_linear(x2d, w, *, tm=256, tn=256, tk=512):
    # x2d: (M, K); w: (K, N) (weight pre-transposed vs. nn.Linear storage)
    M, K = x2d.shape
    _, N = w.shape
    tm = _pick_tile(M, tm, 8)
    tn = _pick_tile(N, tn, 128)
    tk = _pick_tile(K, tk, 128)
    grid = (M // tm, N // tn, K // tk)
    return pl.pallas_call(
        _matmul_kernel,
        out_shape=jax.ShapeDtypeStruct((M, N), x2d.dtype),
        grid=grid,
        in_specs=[
            pl.BlockSpec((tm, tk), lambda i, j, k: (i, k)),
            pl.BlockSpec((tk, tn), lambda i, j, k: (k, j)),
        ],
        out_specs=pl.BlockSpec((tm, tn), lambda i, j, k: (i, j)),
        scratch_shapes=[pltpu.VMEM((tm, tn), jnp.float32)],
        compiler_params=pltpu.CompilerParams(
            dimension_semantics=("parallel", "parallel", "arbitrary"),
            vmem_limit_bytes=_VMEM_LIMIT,
        ),
    )(x2d, w)


# ----------------------------------------------------------------------------
# Flash-style GQA attention (head-group batched, KV-tiled online softmax)
# ----------------------------------------------------------------------------
def _flash_gqa_kernel(q_ref, k_ref, v_ref, o_ref, m_sc, l_sc, acc_sc,
                      *, sm_scale, tq, tkv):
    qi = pl.program_id(2)
    ki = pl.program_id(3)
    nk = pl.num_programs(3)

    @pl.when(ki == 0)
    def _():
        m_sc[...] = jnp.full_like(m_sc, -jnp.inf)
        l_sc[...] = jnp.zeros_like(l_sc)
        acc_sc[...] = jnp.zeros_like(acc_sc)

    q_start = qi * tq
    kv_start = ki * tkv

    # Skip KV blocks that lie entirely above the causal diagonal.
    @pl.when(kv_start <= q_start + tq - 1)
    def _():
        q = q_ref[0, 0]            # (R, tq, hd)
        k = k_ref[0, 0]            # (tkv, hd)
        v = v_ref[0, 0]            # (tkv, hd)

        # Fold softmax scale into Q (touches R*tq*hd, not R*tq*tkv elements);
        # contract last dims directly so K stays in its stored layout.
        s = lax.dot_general(
            q * sm_scale, k,
            dimension_numbers=(((2,), (1,)), ((), ())),
            preferred_element_type=jnp.float32,
        )                           # (R, tq, tkv), f32

        R = q.shape[0]
        row = q_start + lax.broadcasted_iota(jnp.int32, (R, tq, tkv), 1)
        col = kv_start + lax.broadcasted_iota(jnp.int32, (R, tq, tkv), 2)
        # Single select; keeps the reference masked_fill(score == 0, -inf)
        # quirk (exact-zero scores in the lower triangle are also masked).
        keep = (row >= col) & (s != 0.0)
        s = jnp.where(keep, s, -jnp.inf)

        m_prev = m_sc[...]                                # (R, tq, 1)
        m_new = jnp.maximum(m_prev, jnp.max(s, axis=-1, keepdims=True))
        # Guard fully-masked rows (m == -inf) against exp(-inf - -inf) = NaN.
        m_safe = jnp.where(m_new == -jnp.inf, 0.0, m_new)

        alpha = jnp.exp(m_prev - m_safe)                  # (R, tq, 1)
        p = jnp.exp(s - m_safe)                           # (R, tq, tkv)

        l_sc[...] = alpha * l_sc[...] + jnp.sum(p, axis=-1, keepdims=True)
        pv = lax.dot_general(
            p.astype(v.dtype), v,
            dimension_numbers=(((2,), (0,)), ((), ())),
            preferred_element_type=jnp.float32,
        )                                                 # (R, tq, hd)
        acc_sc[...] = alpha * acc_sc[...] + pv
        m_sc[...] = m_new

    @pl.when(ki == nk - 1)
    def _():
        inv_l = pl.reciprocal(l_sc[...], approx=True)
        o_ref[0, 0] = (acc_sc[...] * inv_l).astype(o_ref.dtype)


def pallas_flash_gqa(q, k, v, scale):
    # q: (B, Hkv, R, T, hd)   k, v: (B, Hkv, T, hd)
    B, Hkv, R, T, hd = q.shape
    tq = _pick_tile(T, 256, 8)
    tkv = _pick_tile(T, 512, 8)
    grid = (B, Hkv, T // tq, T // tkv)
    kernel = functools.partial(_flash_gqa_kernel, sm_scale=scale, tq=tq, tkv=tkv)
    # TODO(synk): for tiny head_dim (<128, e.g. this toy's hd=8) the output
    # store is lane-masked; real configs should use hd a multiple of 128.
    return pl.pallas_call(
        kernel,
        out_shape=jax.ShapeDtypeStruct((B, Hkv, R, T, hd), q.dtype),
        grid=grid,
        in_specs=[
            pl.BlockSpec((1, 1, R, tq, hd), lambda b, g, qi, ki: (b, g, 0, qi, 0)),
            pl.BlockSpec((1, 1, tkv, hd), lambda b, g, qi, ki: (b, g, ki, 0)),
            pl.BlockSpec((1, 1, tkv, hd), lambda b, g, qi, ki: (b, g, ki, 0)),
        ],
        out_specs=pl.BlockSpec(
            (1, 1, R, tq, hd), lambda b, g, qi, ki: (b, g, 0, qi, 0)
        ),
        scratch_shapes=[
            pltpu.VMEM((R, tq, 1), jnp.float32),   # running max
            pltpu.VMEM((R, tq, 1), jnp.float32),   # running denom
            pltpu.VMEM((R, tq, hd), jnp.float32),  # output accumulator
        ],
        compiler_params=pltpu.CompilerParams(
            dimension_semantics=("parallel", "parallel", "parallel", "arbitrary"),
            vmem_limit_bytes=_VMEM_LIMIT,
        ),
    )(q, k, v)


# ----------------------------------------------------------------------------
# Plain-JAX glue
# ----------------------------------------------------------------------------
def apply_rotary(x, cos, sin):
    # x: (B, T, H, hd) with interleaved (real, imag) pairs along last dim.
    # cos/sin: (T, hd // 2). Matches torch.view_as_complex(..) * freqs_complex.
    xr = x[..., 0::2]
    xi = x[..., 1::2]
    c = cos[None, :, None, :]
    s = sin[None, :, None, :]
    out_r = xr * c - xi * s
    out_i = xr * s + xi * c
    out = jnp.stack([out_r, out_i], axis=-1).reshape(x.shape)
    return out.astype(x.dtype)


def gqa_forward(x, cos, sin, wq, wk, wv, wo, num_heads, num_kv_heads):
    # use_cache=False path of the reference module.
    # TODO(synk): KV-cache (use_cache=True) branch not implemented.
    B, T, D = x.shape
    hd = D // num_heads
    R = num_heads // num_kv_heads
    scale = 1.0 / math.sqrt(hd)

    x2d = x.reshape(B * T, D)
    q = pallas_linear(x2d, wq).reshape(B, T, num_heads, hd)
    k = pallas_linear(x2d, wk).reshape(B, T, num_kv_heads, hd)
    v = pallas_linear(x2d, wv).reshape(B, T, num_kv_heads, hd)

    q = apply_rotary(q, cos, sin)
    k = apply_rotary(k, cos, sin)

    # Head-group batched layout: q -> (B, Hkv, R, T, hd); k, v -> (B, Hkv, T, hd).
    # (query head g*R + r shares KV head g, matching repeat_kv in the reference)
    q = q.reshape(B, T, num_kv_heads, R, hd).transpose(0, 2, 3, 1, 4)
    k = k.transpose(0, 2, 1, 3)
    v = v.transpose(0, 2, 1, 3)

    o = pallas_flash_gqa(q, k, v, scale)           # (B, Hkv, R, T, hd)

    o = o.transpose(0, 3, 1, 2, 4).reshape(B, T, D)
    return pallas_linear(o.reshape(B * T, D), wo).reshape(B, T, D)


# ----------------------------------------------------------------------------
# Main
# ----------------------------------------------------------------------------
if __name__ == "__main__":
    B, T, D = 2, 8, 32
    num_heads, num_kv_heads = 4, 2
    hd = D // num_heads  # 8

    key = jax.random.PRNGKey(0)
    kx, kq, kk, kv_, ko = jax.random.split(key, 5)

    x = jax.random.normal(kx, (B, T, D), dtype=jnp.float32)

    # nn.Linear(in, out, bias=False) weights; stored pre-transposed as (in, out)
    wq = 0.05 * jax.random.normal(kq, (D, D), dtype=jnp.float32)
    wk = 0.05 * jax.random.normal(kk, (D, num_kv_heads * hd), dtype=jnp.float32)
    wv = 0.05 * jax.random.normal(kv_, (D, num_kv_heads * hd), dtype=jnp.float32)
    wo = 0.05 * jax.random.normal(ko, (D, D), dtype=jnp.float32)

    # freqs_complex equivalent: cos/sin of pos * inv_freq, shape (T, hd//2)
    pos = jnp.arange(T, dtype=jnp.float32)
    inv_freq = 1.0 / (10000.0 ** (jnp.arange(0, hd, 2, dtype=jnp.float32) / hd))
    freqs = pos[:, None] * inv_freq[None, :]
    cos, sin = jnp.cos(freqs), jnp.sin(freqs)

    fwd = jax.jit(
        functools.partial(
            gqa_forward, num_heads=num_heads, num_kv_heads=num_kv_heads
        )
    )
    out = fwd(x, cos, sin, wq, wk, wv, wo)
    jax.block_until_ready(out)
    assert out.shape == (B, T, D)
    print("KERNEL_OK")
</pallas_src>

<mosaic_0001>
module attributes {stable_mosaic.version = 11 : i64} {
  func.func @_matmul_kernel(%arg0: i32, %arg1: i32, %arg2: i32, %arg3: memref<16x32xf32, #tpu.memory_space<vmem>>, %arg4: memref<32x16xf32, #tpu.memory_space<vmem>>, %arg5: memref<16x16xf32, #tpu.memory_space<vmem>>, %arg6: memref<16x16xf32, #tpu.memory_space<vmem>>) attributes {dimension_semantics = [#tpu.dimension_semantics<parallel>, #tpu.dimension_semantics<parallel>, #tpu.dimension_semantics<arbitrary>], iteration_bounds = array<i64: 1, 1, 1>, scalar_prefetch = 0 : i64, scratch_operands = 1 : i64, tpu.core_type = #tpu.core_type<tc>, window_params = [{transform_indices = @transform_0, window_bounds = array<i64: 16, 32>}, {transform_indices = @transform_1, window_bounds = array<i64: 32, 16>}, {transform_indices = @transform_2, window_bounds = array<i64: 16, 16>}]} {
    %c0_i32 = arith.constant 0 : i32
    %0 = arith.cmpi eq, %arg2, %c0_i32 : i32
    %1 = arith.extui %0 : i1 to i32
    %c0_i32_0 = arith.constant 0 : i32
    %2 = arith.cmpi ne, %1, %c0_i32_0 : i32
    scf.if %2 {
      %cst_10 = arith.constant 0.000000e+00 : f32
      %12 = vector.broadcast %cst_10 : f32 to vector<16x16xf32>
      %c0_11 = arith.constant 0 : index
      %c0_12 = arith.constant 0 : index
      %13 = vector.load %arg6[%c0_11, %c0_12] : memref<16x16xf32, #tpu.memory_space<vmem>>, vector<16x16xf32>
      tpu.vector_store %arg6[%c0_11, %c0_12], %12 {strides = array<i32>} : memref<16x16xf32, #tpu.memory_space<vmem>>, vector<16x16xf32>,
    } else {
    }
    %c0 = arith.constant 0 : index
    %c0_1 = arith.constant 0 : index
    %3 = vector.load %arg6[%c0, %c0_1] : memref<16x16xf32, #tpu.memory_space<vmem>>, vector<16x16xf32>
    %c0_2 = arith.constant 0 : index
    %c0_3 = arith.constant 0 : index
    %4 = vector.load %arg3[%c0_2, %c0_3] : memref<16x32xf32, #tpu.memory_space<vmem>>, vector<16x32xf32>
    %c0_4 = arith.constant 0 : index
    %c0_5 = arith.constant 0 : index
    %5 = vector.load %arg4[%c0_4, %c0_5] : memref<32x16xf32, #tpu.memory_space<vmem>>, vector<32x16xf32>
    %cst = arith.constant dense<0.000000e+00> : vector<16x16xf32>
    %6 = tpu.matmul %4, %5, %cst {dimension_numbers = #tpu.dot_dimension_numbers<[1], [0], [0], [1], [0, 0, 1, 1], [], []>} : vector<16x32xf32>, vector<32x16xf32>, vector<16x16xf32> -> vector<16x16xf32>
    %7 = arith.addf %3, %6 : vector<16x16xf32>
    %c0_6 = arith.constant 0 : index
    %c0_7 = arith.constant 0 : index
    %8 = vector.load %arg6[%c0_6, %c0_7] : memref<16x16xf32, #tpu.memory_space<vmem>>, vector<16x16xf32>
    tpu.vector_store %arg6[%c0_6, %c0_7], %7 {strides = array<i32>} : memref<16x16xf32, #tpu.memory_space<vmem>>, vector<16x16xf32>,
    %c0_i32_8 = arith.constant 0 : i32
    %9 = arith.cmpi eq, %arg2, %c0_i32_8 : i32
    %10 = arith.extui %9 : i1 to i32
    %c0_i32_9 = arith.constant 0 : i32
    %11 = arith.cmpi ne, %10, %c0_i32_9 : i32
    scf.if %11 {
      %c0_10 = arith.constant 0 : index
      %c0_11 = arith.constant 0 : index
      %12 = vector.load %arg6[%c0_10, %c0_11] : memref<16x16xf32, #tpu.memory_space<vmem>>, vector<16x16xf32>
      %c0_12 = arith.constant 0 : index
      %c0_13 = arith.constant 0 : index
      %13 = vector.load %arg5[%c0_12, %c0_13] : memref<16x16xf32, #tpu.memory_space<vmem>>, vector<16x16xf32>
      tpu.vector_store %arg5[%c0_12, %c0_13], %12 {strides = array<i32>} : memref<16x16xf32, #tpu.memory_space<vmem>>, vector<16x16xf32>,
    } else {
    }
    return
  }
  func.func @transform_0(%arg0: i32, %arg1: i32, %arg2: i32) -> (i32, i32) {
    %c0_i32 = arith.constant 0 : i32
    return %arg0, %arg2 : i32, i32
  }
  func.func @transform_1(%arg0: i32, %arg1: i32, %arg2: i32) -> (i32, i32) {
    %c0_i32 = arith.constant 0 : i32
    return %arg2, %arg1 : i32, i32
  }
  func.func @transform_2(%arg0: i32, %arg1: i32, %arg2: i32) -> (i32, i32) {
    %c0_i32 = arith.constant 0 : i32
    return %arg0, %arg1 : i32, i32
  }
}

module attributes {stable_mosaic.version = 11 : i64} {
  func.func @_matmul_kernel(%arg0: i32, %arg1: i32, %arg2: i32, %arg3: memref<16x32xf32, #tpu.memory_space<vmem>>, %arg4: memref<32x32xf32, #tpu.memory_space<vmem>>, %arg5: memref<16x32xf32, #tpu.memory_space<vmem>>, %arg6: memref<16x32xf32, #tpu.memory_space<vmem>>) attributes {dimension_semantics = [#tpu.dimension_semantics<parallel>, #tpu.dimension_semantics<parallel>, #tpu.dimension_semantics<arbitrary>], iteration_bounds = array<i64: 1, 1, 1>, scalar_prefetch = 0 : i64, scratch_operands = 1 : i64, tpu.core_type = #tpu.core_type<tc>, window_params = [{transform_indices = @transform_0, window_bounds = array<i64: 16, 32>}, {transform_indices = @transform_1, window_bounds = array<i64: 32, 32>}, {transform_indices = @transform_2, window_bounds = array<i64: 16, 32>}]} {
    %c0_i32 = arith.constant 0 : i32
    %0 = arith.cmpi eq, %arg2, %c0_i32 : i32
    %1 = arith.extui %0 : i1 to i32
    %c0_i32_0 = arith.constant 0 : i32
    %2 = arith.cmpi ne, %1, %c0_i32_0 : i32
    scf.if %2 {
      %cst_10 = arith.constant 0.000000e+00 : f32
      %12 = vector.broadcast %cst_10 : f32 to vector<16x32xf32>
      %c0_11 = arith.constant 0 : index
      %c0_12 = arith.constant 0 : index
      %13 = vector.load %arg6[%c0_11, %c0_12] : memref<16x32xf32, #tpu.memory_space<vmem>>, vector<16x32xf32>
      tpu.vector_store %arg6[%c0_11, %c0_12], %12 {strides = array<i32>} : memref<16x32xf32, #tpu.memory_space<vmem>>, vector<16x32xf32>,
    } else {
    }
    %c0 = arith.constant 0 : index
    %c0_1 = arith.constant 0 : index
    %3 = vector.load %arg6[%c0, %c0_1] : memref<16x32xf32, #tpu.memory_space<vmem>>, vector<16x32xf32>
    %c0_2 = arith.constant 0 : index
    %c0_3 = arith.constant 0 : index
    %4 = vector.load %arg3[%c0_2, %c0_3] : memref<16x32xf32, #tpu.memory_space<vmem>>, vector<16x32xf32>
    %c0_4 = arith.constant 0 : index
    %c0_5 = arith.constant 0 : index
    %5 = vector.load %arg4[%c0_4, %c0_5] : memref<32x32xf32, #tpu.memory_space<vmem>>, vector<32x32xf32>
    %cst = arith.constant dense<0.000000e+00> : vector<16x32xf32>
    %6 = tpu.matmul %4, %5, %cst {dimension_numbers = #tpu.dot_dimension_numbers<[1], [0], [0], [1], [0, 0, 1, 1], [], []>} : vector<16x32xf32>, vector<32x32xf32>, vector<16x32xf32> -> vector<16x32xf32>
    %7 = arith.addf %3, %6 : vector<16x32xf32>
    %c0_6 = arith.constant 0 : index
    %c0_7 = arith.constant 0 : index
    %8 = vector.load %arg6[%c0_6, %c0_7] : memref<16x32xf32, #tpu.memory_space<vmem>>, vector<16x32xf32>
    tpu.vector_store %arg6[%c0_6, %c0_7], %7 {strides = array<i32>} : memref<16x32xf32, #tpu.memory_space<vmem>>, vector<16x32xf32>,
    %c0_i32_8 = arith.constant 0 : i32
    %9 = arith.cmpi eq, %arg2, %c0_i32_8 : i32
    %10 = arith.extui %9 : i1 to i32
    %c0_i32_9 = arith.constant 0 : i32
    %11 = arith.cmpi ne, %10, %c0_i32_9 : i32
    scf.if %11 {
      %c0_10 = arith.constant 0 : index
      %c0_11 = arith.constant 0 : index
      %12 = vector.load %arg6[%c0_10, %c0_11] : memref<16x32xf32, #tpu.memory_space<vmem>>, vector<16x32xf32>
      %c0_12 = arith.constant 0 : index
      %c0_13 = arith.constant 0 : index
      %13 = vector.load %arg5[%c0_12, %c0_13] : memref<16x32xf32, #tpu.memory_space<vmem>>, vector<16x32xf32>
      tpu.vector_store %arg5[%c0_12, %c0_13], %12 {strides = array<i32>} : memref<16x32xf32, #tpu.memory_space<vmem>>, vector<16x32xf32>,
    } else {
    }
    return
  }
  func.func @transform_0(%arg0: i32, %arg1: i32, %arg2: i32) -> (i32, i32) {
    %c0_i32 = arith.constant 0 : i32
    return %arg0, %arg2 : i32, i32
  }
  func.func @transform_1(%arg0: i32, %arg1: i32, %arg2: i32) -> (i32, i32) {
    %c0_i32 = arith.constant 0 : i32
    return %arg2, %arg1 : i32, i32
  }
  func.func @transform_2(%arg0: i32, %arg1: i32, %arg2: i32) -> (i32, i32) {
    %c0_i32 = arith.constant 0 : i32
    return %arg0, %arg1 : i32, i32
  }
}

module attributes {stable_mosaic.version = 11 : i64} {
  func.func @_flash_gqa_kernel(%arg0: i32, %arg1: i32, %arg2: i32, %arg3: i32, %arg4: memref<1x1x2x8x8xf32, #tpu.memory_space<vmem>>, %arg5: memref<1x1x8x8xf32, #tpu.memory_space<vmem>>, %arg6: memref<1x1x8x8xf32, #tpu.memory_space<vmem>>, %arg7: memref<1x1x2x8x8xf32, #tpu.memory_space<vmem>>, %arg8: memref<2x8x1xf32, #tpu.memory_space<vmem>>, %arg9: memref<2x8x1xf32, #tpu.memory_space<vmem>>, %arg10: memref<2x8x8xf32, #tpu.memory_space<vmem>>) attributes {dimension_semantics = [#tpu.dimension_semantics<parallel>, #tpu.dimension_semantics<parallel>, #tpu.dimension_semantics<parallel>, #tpu.dimension_semantics<arbitrary>], iteration_bounds = array<i64: 2, 2, 1, 1>, scalar_prefetch = 0 : i64, scratch_operands = 3 : i64, tpu.core_type = #tpu.core_type<tc>, window_params = [{transform_indices = @transform_0, window_bounds = array<i64: 1, 1, 2, 8, 8>}, {transform_indices = @transform_1, window_bounds = array<i64: 1, 1, 8, 8>}, {transform_indices = @transform_2, window_bounds = array<i64: 1, 1, 8, 8>}, {transform_indices = @transform_3, window_bounds = array<i64: 1, 1, 2, 8, 8>}]} {
    %c0_i32 = arith.constant 0 : i32
    %0 = arith.cmpi eq, %arg3, %c0_i32 : i32
    %1 = arith.extui %0 : i1 to i32
    %c0_i32_0 = arith.constant 0 : i32
    %2 = arith.cmpi ne, %1, %c0_i32_0 : i32
    scf.if %2 {
      %cst = arith.constant 0xFF800000 : f32
      %13 = vector.broadcast %cst : f32 to vector<2x8x1xf32>
      %c0 = arith.constant 0 : index
      %c0_6 = arith.constant 0 : index
      %c0_7 = arith.constant 0 : index
      %14 = vector.load %arg8[%c0, %c0_6, %c0_7] : memref<2x8x1xf32, #tpu.memory_space<vmem>>, vector<2x8x1xf32>
      tpu.vector_store %arg8[%c0, %c0_6, %c0_7], %13 {strides = array<i32>} : memref<2x8x1xf32, #tpu.memory_space<vmem>>, vector<2x8x1xf32>,
      %cst_8 = arith.constant 0.000000e+00 : f32
      %15 = vector.broadcast %cst_8 : f32 to vector<2x8x1xf32>
      %c0_9 = arith.constant 0 : index
      %c0_10 = arith.constant 0 : index
      %c0_11 = arith.constant 0 : index
      %16 = vector.load %arg9[%c0_9, %c0_10, %c0_11] : memref<2x8x1xf32, #tpu.memory_space<vmem>>, vector<2x8x1xf32>
      tpu.vector_store %arg9[%c0_9, %c0_10, %c0_11], %15 {strides = array<i32>} : memref<2x8x1xf32, #tpu.memory_space<vmem>>, vector<2x8x1xf32>,
      %cst_12 = arith.constant 0.000000e+00 : f32
      %17 = vector.broadcast %cst_12 : f32 to vector<2x8x8xf32>
      %c0_13 = arith.constant 0 : index
      %c0_14 = arith.constant 0 : index
      %c0_15 = arith.constant 0 : index
      %18 = vector.load %arg10[%c0_13, %c0_14, %c0_15] : memref<2x8x8xf32, #tpu.memory_space<vmem>>, vector<2x8x8xf32>
      tpu.vector_store %arg10[%c0_13, %c0_14, %c0_15], %17 {strides = array<i32>} : memref<2x8x8xf32, #tpu.memory_space<vmem>>, vector<2x8x8xf32>,
    } else {
    }
    %c8_i32 = arith.constant 8 : i32
    %3 = arith.muli %arg2, %c8_i32 : i32
    %c8_i32_1 = arith.constant 8 : i32
    %4 = arith.muli %arg3, %c8_i32_1 : i32
    %c8_i32_2 = arith.constant 8 : i32
    %5 = arith.addi %3, %c8_i32_2 : i32
    %c1_i32 = arith.constant 1 : i32
    %6 = arith.subi %5, %c1_i32 : i32
    %7 = arith.cmpi sle, %4, %6 : i32
    %8 = arith.extui %7 : i1 to i32
    %c0_i32_3 = arith.constant 0 : i32
    %9 = arith.cmpi ne, %8, %c0_i32_3 : i32
    scf.if %9 {
      %c0 = arith.constant 0 : index
      %c0_6 = arith.constant 0 : index
      %c0_7 = arith.constant 0 : index
      %c0_8 = arith.constant 0 : index
      %c0_9 = arith.constant 0 : index
      %13 = vector.load %arg4[%c0, %c0_6, %c0_7, %c0_8, %c0_9] : memref<1x1x2x8x8xf32, #tpu.memory_space<vmem>>, vector<1x1x2x8x8xf32>
      %14 = vector.shape_cast %13 : vector<1x1x2x8x8xf32> to vector<2x8x8xf32>
      %c0_10 = arith.constant 0 : index
      %c0_11 = arith.constant 0 : index
      %c0_12 = arith.constant 0 : index
      %c0_13 = arith.constant 0 : index
      %15 = vector.load %arg5[%c0_10, %c0_11, %c0_12, %c0_13] : memref<1x1x8x8xf32, #tpu.memory_space<vmem>>, vector<1x1x8x8xf32>
      %16 = vector.shape_cast %15 : vector<1x1x8x8xf32> to vector<8x8xf32>
      %c0_14 = arith.constant 0 : index
      %c0_15 = arith.constant 0 : index
      %c0_16 = arith.constant 0 : index
      %c0_17 = arith.constant 0 : index
      %17 = vector.load %arg6[%c0_14, %c0_15, %c0_16, %c0_17] : memref<1x1x8x8xf32, #tpu.memory_space<vmem>>, vector<1x1x8x8xf32>
      %18 = vector.shape_cast %17 : vector<1x1x8x8xf32> to vector<8x8xf32>
      %cst = arith.constant 0.353553385 : f32
      %19 = vector.broadcast %cst : f32 to vector<2x8x8xf32>
      %20 = arith.mulf %14, %19 : vector<2x8x8xf32>
      %cst_18 = arith.constant dense<0.000000e+00> : vector<2x8x8xf32>
      %21 = tpu.matmul %20, %16, %cst_18 {dimension_numbers = #tpu.dot_dimension_numbers<[2], [1], [0, 1], [0], [0, 0, 0, 1, 1, 0], [], []>} : vector<2x8x8xf32>, vector<8x8xf32>, vector<2x8x8xf32> -> vector<2x8x8xf32>
      %22 = tpu.iota {dimensions = array<i32: 1>} : vector<2x8x8xi32>
      %23 = vector.broadcast %3 : i32 to vector<2x8x8xi32>
      %24 = arith.addi %23, %22 : vector<2x8x8xi32>
      %25 = tpu.iota {dimensions = array<i32: 2>} : vector<2x8x8xi32>
      %26 = vector.broadcast %4 : i32 to vector<2x8x8xi32>
      %27 = arith.addi %26, %25 : vector<2x8x8xi32>
      %28 = arith.cmpi sge, %24, %27 : vector<2x8x8xi32>
      %cst_19 = arith.constant 0.000000e+00 : f32
      %29 = vector.broadcast %cst_19 : f32 to vector<2x8x8xf32>
      %30 = arith.cmpf one, %21, %29 : vector<2x8x8xf32>
      %31 = arith.andi %28, %30 : vector<2x8x8xi1>
      %cst_20 = arith.constant 0xFF800000 : f32
      %32 = vector.broadcast %cst_20 : f32 to vector<2x8x8xf32>
      %33 = arith.select %31, %21, %32 : vector<2x8x8xi1>, vector<2x8x8xf32>
      %c0_21 = arith.constant 0 : index
      %c0_22 = arith.constant 0 : index
      %c0_23 = arith.constant 0 : index
      %34 = vector.load %arg8[%c0_21, %c0_22, %c0_23] : memref<2x8x1xf32, #tpu.memory_space<vmem>>, vector<2x8x1xf32>
      %cst_24 = arith.constant dense<0xFF800000> : vector<2x8xf32>
      %35 = vector.multi_reduction <maximumf>, %33, %cst_24 [2] : vector<2x8x8xf32> to vector<2x8xf32>
      %36 = vector.shape_cast %35 : vector<2x8xf32> to vector<2x8x1xf32>
      %37 = arith.maximumf %34, %36 : vector<2x8x1xf32>
      %cst_25 = arith.constant 0xFF800000 : f32
      %38 = vector.broadcast %cst_25 : f32 to vector<2x8x1xf32>
      %39 = arith.cmpf oeq, %37, %38 : vector<2x8x1xf32>
      %cst_26 = arith.constant 0.000000e+00 : f32
      %40 = vector.broadcast %cst_26 : f32 to vector<2x8x1xf32>
      %41 = arith.select %39, %40, %37 : vector<2x8x1xi1>, vector<2x8x1xf32>
      %42 = arith.subf %34, %41 : vector<2x8x1xf32>
      %43 = math.exp %42 : vector<2x8x1xf32>
      %44 = vector.broadcast %41 : vector<2x8x1xf32> to vector<2x8x8xf32>
      %45 = arith.subf %33, %44 : vector<2x8x8xf32>
      %46 = math.exp %45 : vector<2x8x8xf32>
      %c0_27 = arith.constant 0 : index
      %c0_28 = arith.constant 0 : index
      %c0_29 = arith.constant 0 : index
      %47 = vector.load %arg9[%c0_27, %c0_28, %c0_29] : memref<2x8x1xf32, #tpu.memory_space<vmem>>, vector<2x8x1xf32>
      %48 = arith.mulf %43, %47 : vector<2x8x1xf32>
      %cst_30 = arith.constant dense<0.000000e+00> : vector<2x8xf32>
      %49 = vector.multi_reduction <add>, %46, %cst_30 [2] : vector<2x8x8xf32> to vector<2x8xf32>
      %50 = vector.shape_cast %49 : vector<2x8xf32> to vector<2x8x1xf32>
      %51 = arith.addf %48, %50 : vector<2x8x1xf32>
      %c0_31 = arith.constant 0 : index
      %c0_32 = arith.constant 0 : index
      %c0_33 = arith.constant 0 : index
      %52 = vector.load %arg9[%c0_31, %c0_32, %c0_33] : memref<2x8x1xf32, #tpu.memory_space<vmem>>, vector<2x8x1xf32>
      tpu.vector_store %arg9[%c0_31, %c0_32, %c0_33], %51 {strides = array<i32>} : memref<2x8x1xf32, #tpu.memory_space<vmem>>, vector<2x8x1xf32>,
      %cst_34 = arith.constant dense<0.000000e+00> : vector<2x8x8xf32>
      %53 = tpu.matmul %46, %18, %cst_34 {dimension_numbers = #tpu.dot_dimension_numbers<[2], [0], [0, 1], [1], [0, 0, 0, 1, 1, 1], [], []>} : vector<2x8x8xf32>, vector<8x8xf32>, vector<2x8x8xf32> -> vector<2x8x8xf32>
      %c0_35 = arith.constant 0 : index
      %c0_36 = arith.constant 0 : index
      %c0_37 = arith.constant 0 : index
      %54 = vector.load %arg10[%c0_35, %c0_36, %c0_37] : memref<2x8x8xf32, #tpu.memory_space<vmem>>, vector<2x8x8xf32>
      %55 = vector.broadcast %43 : vector<2x8x1xf32> to vector<2x8x8xf32>
      %56 = arith.mulf %55, %54 : vector<2x8x8xf32>
      %57 = arith.addf %56, %53 : vector<2x8x8xf32>
      %c0_38 = arith.constant 0 : index
      %c0_39 = arith.constant 0 : index
      %c0_40 = arith.constant 0 : index
      %58 = vector.load %arg10[%c0_38, %c0_39, %c0_40] : memref<2x8x8xf32, #tpu.memory_space<vmem>>, vector<2x8x8xf32>
      tpu.vector_store %arg10[%c0_38, %c0_39, %c0_40], %57 {strides = array<i32>} : memref<2x8x8xf32, #tpu.memory_space<vmem>>, vector<2x8x8xf32>,
      %c0_41 = arith.constant 0 : index
      %c0_42 = arith.constant 0 : index
      %c0_43 = arith.constant 0 : index
      %59 = vector.load %arg8[%c0_41, %c0_42, %c0_43] : memref<2x8x1xf32, #tpu.memory_space<vmem>>, vector<2x8x1xf32>
      tpu.vector_store %arg8[%c0_41, %c0_42, %c0_43], %37 {strides = array<i32>} : memref<2x8x1xf32, #tpu.memory_space<vmem>>, vector<2x8x1xf32>,
    } else {
    }
    %c0_i32_4 = arith.constant 0 : i32
    %10 = arith.cmpi eq, %arg3, %c0_i32_4 : i32
    %11 = arith.extui %10 : i1 to i32
    %c0_i32_5 = arith.constant 0 : i32
    %12 = arith.cmpi ne, %11, %c0_i32_5 : i32
    scf.if %12 {
      %c0 = arith.constant 0 : index
      %c0_6 = arith.constant 0 : index
      %c0_7 = arith.constant 0 : index
      %13 = vector.load %arg9[%c0, %c0_6, %c0_7] : memref<2x8x1xf32, #tpu.memory_space<vmem>>, vector<2x8x1xf32>
      %14 = tpu.reciprocal %13 {approx = true} : vector<2x8x1xf32> -> vector<2x8x1xf32>
      %c0_8 = arith.constant 0 : index
      %c0_9 = arith.constant 0 : index
      %c0_10 = arith.constant 0 : index
      %15 = vector.load %arg10[%c0_8, %c0_9, %c0_10] : memref<2x8x8xf32, #tpu.memory_space<vmem>>, vector<2x8x8xf32>
      %16 = vector.broadcast %14 : vector<2x8x1xf32> to vector<2x8x8xf32>
      %17 = arith.mulf %15, %16 : vector<2x8x8xf32>
      %c0_11 = arith.constant 0 : index
      %c0_12 = arith.constant 0 : index
      %c0_13 = arith.constant 0 : index
      %c0_14 = arith.constant 0 : index
      %c0_15 = arith.constant 0 : index
      %18 = vector.load %arg7[%c0_11, %c0_12, %c0_13, %c0_14, %c0_15] : memref<1x1x2x8x8xf32, #tpu.memory_space<vmem>>, vector<1x1x2x8x8xf32>
      %19 = vector.shape_cast %18 : vector<1x1x2x8x8xf32> to vector<2x8x8xf32>
      %20 = vector.shape_cast %17 : vector<2x8x8xf32> to vector<1x1x2x8x8xf32>
      tpu.vector_store %arg7[%c0_11, %c0_12, %c0_13, %c0_14, %c0_15], %20 {strides = array<i32>} : memref<1x1x2x8x8xf32, #tpu.memory_space<vmem>>, vector<1x1x2x8x8xf32>,
    } else {
    }
    return
  }
  func.func @transform_0(%arg0: i32, %arg1: i32, %arg2: i32, %arg3: i32) -> (i32, i32, i32, i32, i32) {
    %c0_i32 = arith.constant 0 : i32
    %c0_i32_0 = arith.constant 0 : i32
    %c0_i32_1 = arith.constant 0 : i32
    return %arg0, %arg1, %c0_i32, %arg2, %c0_i32_0 : i32, i32, i32, i32, i32
  }
  func.func @transform_1(%arg0: i32, %arg1: i32, %arg2: i32, %arg3: i32) -> (i32, i32, i32, i32) {
    %c0_i32 = arith.constant 0 : i32
    %c0_i32_0 = arith.constant 0 : i32
    return %arg0, %arg1, %arg3, %c0_i32 : i32, i32, i32, i32
  }
  func.func @transform_2(%arg0: i32, %arg1: i32, %arg2: i32, %arg3: i32) -> (i32, i32, i32, i32) {
    %c0_i32 = arith.constant 0 : i32
    %c0_i32_0 = arith.constant 0 : i32
    return %arg0, %arg1, %arg3, %c0_i32 : i32, i32, i32, i32
  }
  func.func @transform_3(%arg0: i32, %arg1: i32, %arg2: i32, %arg3: i32) -> (i32, i32, i32, i32, i32) {
    %c0_i32 = arith.constant 0 : i32
    %c0_i32_0 = arith.constant 0 : i32
    %c0_i32_1 = arith.constant 0 : i32
    return %arg0, %arg1, %c0_i32, %arg2, %c0_i32_0 : i32, i32, i32, i32, i32
  }
}

module attributes {stable_mosaic.version = 11 : i64} {
  func.func @_matmul_kernel(%arg0: i32, %arg1: i32, %arg2: i32, %arg3: memref<16x32xf32, #tpu.memory_space<vmem>>, %arg4: memref<32x32xf32, #tpu.memory_space<vmem>>, %arg5: memref<16x32xf32, #tpu.memory_space<vmem>>, %arg6: memref<16x32xf32, #tpu.memory_space<vmem>>) attributes {dimension_semantics = [#tpu.dimension_semantics<parallel>, #tpu.dimension_semantics<parallel>, #tpu.dimension_semantics<arbitrary>], iteration_bounds = array<i64: 1, 1, 1>, scalar_prefetch = 0 : i64, scratch_operands = 1 : i64, tpu.core_type = #tpu.core_type<tc>, window_params = [{transform_indices = @transform_0, window_bounds = array<i64: 16, 32>}, {transform_indices = @transform_1, window_bounds = array<i64: 32, 32>}, {transform_indices = @transform_2, window_bounds = array<i64: 16, 32>}]} {
    %c0_i32 = arith.constant 0 : i32
    %0 = arith.cmpi eq, %arg2, %c0_i32 : i32
    %1 = arith.extui %0 : i1 to i32
    %c0_i32_0 = arith.constant 0 : i32
    %2 = arith.cmpi ne, %1, %c0_i32_0 : i32
    scf.if %2 {
      %cst_10 = arith.constant 0.000000e+00 : f32
      %12 = vector.broadcast %cst_10 : f32 to vector<16x32xf32>
      %c0_11 = arith.constant 0 : index
      %c0_12 = arith.constant 0 : index
      %13 = vector.load %arg6[%c0_11, %c0_12] : memref<16x32xf32, #tpu.memory_space<vmem>>, vector<16x32xf32>
      tpu.vector_store %arg6[%c0_11, %c0_12], %12 {strides = array<i32>} : memref<16x32xf32, #tpu.memory_space<vmem>>, vector<16x32xf32>,
    } else {
    }
    %c0 = arith.constant 0 : index
    %c0_1 = arith.constant 0 : index
    %3 = vector.load %arg6[%c0, %c0_1] : memref<16x32xf32, #tpu.memory_space<vmem>>, vector<16x32xf32>
    %c0_2 = arith.constant 0 : index
    %c0_3 = arith.constant 0 : index
    %4 = vector.load %arg3[%c0_2, %c0_3] : memref<16x32xf32, #tpu.memory_space<vmem>>, vector<16x32xf32>
    %c0_4 = arith.constant 0 : index
    %c0_5 = arith.constant 0 : index
    %5 = vector.load %arg4[%c0_4, %c0_5] : memref<32x32xf32, #tpu.memory_space<vmem>>, vector<32x32xf32>
    %cst = arith.constant dense<0.000000e+00> : vector<16x32xf32>
    %6 = tpu.matmul %4, %5, %cst {dimension_numbers = #tpu.dot_dimension_numbers<[1], [0], [0], [1], [0, 0, 1, 1], [], []>} : vector<16x32xf32>, vector<32x32xf32>, vector<16x32xf32> -> vector<16x32xf32>
    %7 = arith.addf %3, %6 : vector<16x32xf32>
    %c0_6 = arith.constant 0 : index
    %c0_7 = arith.constant 0 : index
    %8 = vector.load %arg6[%c0_6, %c0_7] : memref<16x32xf32, #tpu.memory_space<vmem>>, vector<16x32xf32>
    tpu.vector_store %arg6[%c0_6, %c0_7], %7 {strides = array<i32>} : memref<16x32xf32, #tpu.memory_space<vmem>>, vector<16x32xf32>,
    %c0_i32_8 = arith.constant 0 : i32
    %9 = arith.cmpi eq, %arg2, %c0_i32_8 : i32
    %10 = arith.extui %9 : i1 to i32
    %c0_i32_9 = arith.constant 0 : i32
    %11 = arith.cmpi ne, %10, %c0_i32_9 : i32
    scf.if %11 {
      %c0_10 = arith.constant 0 : index
      %c0_11 = arith.constant 0 : index
      %12 = vector.load %arg6[%c0_10, %c0_11] : memref<16x32xf32, #tpu.memory_space<vmem>>, vector<16x32xf32>
      %c0_12 = arith.constant 0 : index
      %c0_13 = arith.constant 0 : index
      %13 = vector.load %arg5[%c0_12, %c0_13] : memref<16x32xf32, #tpu.memory_space<vmem>>, vector<16x32xf32>
      tpu.vector_store %arg5[%c0_12, %c0_13], %12 {strides = array<i32>} : memref<16x32xf32, #tpu.memory_space<vmem>>, vector<16x32xf32>,
    } else {
    }
    return
  }
  func.func @transform_0(%arg0: i32, %arg1: i32, %arg2: i32) -> (i32, i32) {
    %c0_i32 = arith.constant 0 : i32
    return %arg0, %arg2 : i32, i32
  }
  func.func @transform_1(%arg0: i32, %arg1: i32, %arg2: i32) -> (i32, i32) {
    %c0_i32 = arith.constant 0 : i32
    return %arg2, %arg1 : i32, i32
  }
  func.func @transform_2(%arg0: i32, %arg1: i32, %arg2: i32) -> (i32, i32) {
    %c0_i32 = arith.constant 0 : i32
    return %arg0, %arg1 : i32, i32
  }
}

</mosaic_0001>

<bundles_post_ra>
// kernel: gqa_forward.6
= control target key start
LH: loop header
LB: loop body
LE: loop exit
PB: predicated region body
PF: predicated region fallthrough
CT: control target
= control target key end

     0   :  { %vm26_vm0 = vcmask 261120   ;;  %vm15_vm1 = vcmask 130048   ;;  %v144_v2 = vmov 0.0   ;;  %s192_s1 = inlined_call_operand.vmem [shape: f32[32,16], index: 1, kind: input, shape index: {}]   ;;  %s193_s0 = inlined_call_operand.vmem [shape: f32[16,32], index: 0, kind: input, shape index: {}]   ;;  %s194_s2 = inlined_call_operand.vmem [shape: f32[16,16], index: 2, kind: output, shape index: {}]  }
   0x1   :  { %v25_v0 = vld [vmem:[%s192_s1 + $0x18] sm:$0xff]  ;;  %v24_v1 = vld [vmem:[%s192_s1 + $0x10] sm:$0xff]  ;;  %17 = vst.msk [vmem:[#allocation2 + $0x8] sm:$0xff] %vm15_vm1, %v144_v2  ;;  %16 = vst.msk [vmem:[#allocation2] sm:$0xff] %vm15_vm1, %v144_v2 }
   0x2   :  { %132 = vmatprep.subr.mxu0 %v25_v0  ;;  %v20_v3 = vld [vmem:[%s193_s0] sm:$0xff]  ;;  %v23_v4 = vld [vmem:[%s192_s1 + $0x8] sm:$0xff] }
   0x3   :  { %133 = vmatpush3.msra.mxu0 %v25_v0  ;;  %140 = vmatprep.mubr.msk.f32.mxu0 %vm26_vm0, %v20_v3  ;;  %v22_v5 = vld [vmem:[%s192_s1] sm:$0xff]  ;;  %v21_v6 = vld [vmem:[%s193_s0 + $0x8] sm:$0xff] }
   0x4   :  { %134 = vmatprep.subr.mxu0 %v24_v1 }
   0x5   :  { %135 = vmatpush3.msra.mxu0 %v24_v1 }
   0x6   :  { %136 = vmatprep.subr.mxu0 %v23_v4 }
   0x7   :  { %137 = vmatpush3.msra.mxu0 %v23_v4 }
   0x8   :  { %138 = vmatprep.subr.mxu0 %v22_v5  ;;  %v19_v7 = vld [vmem:[#allocation2 + $0x8] sm:$0xff]  ;;  %v18_v9 = vld [vmem:[#allocation2] sm:$0xff] }
   0x9   :  { %139 = vmatpush3.msra.mxu0 %v22_v5 }
   0xa   :  { %141 = vmatmul.mubr.msk.f32.vlgmr.msra.gmra.mxu0 %vm26_vm0, %v21_v6 }
  0xca   :  { %v142_v8 = vpop.f32.mrf.mxu0 }
  0xcb   :  { %v109_v10 = vadd.f32 %v142_v8, %v19_v7 }
  0xcc   :  { %v99_v11 = vpop.f32.mrf.mxu0 }
  0xcd   :  { %112 = vst.msk [vmem:[#allocation2 + $0x8] sm:$0xff] %vm15_vm1, %v109_v10  ;;  %v108_v12 = vadd.f32 %v99_v11, %v18_v9 }
  0xcf   :  { %111 = vst.msk [vmem:[#allocation2] sm:$0xff] %vm15_vm1, %v108_v12 }
  0xd4   :  { %v117_v13 = vld [vmem:[#allocation2 + $0x8] sm:$0xff] }
  0xd5   :  { %119 = vst.msk [vmem:[%s194_s2 + $0x8] sm:$0xff] %vm15_vm1, %v117_v13 }
  0xd6   :  { %v116_v14 = vld [vmem:[#allocation2] sm:$0xff] }
  0xd7   :  { %118 = vst.msk [vmem:[%s194_s2] sm:$0xff] %vm15_vm1, %v116_v14 }

// kernel: gqa_forward.5
= control target key start
LH: loop header
LB: loop body
LE: loop exit
PB: predicated region body
PF: predicated region fallthrough
CT: control target
= control target key end

     0   :  { %vm15_vm0 = vcmask 261120   ;;  %v143_v2 = vmov 0.0   ;;  %s191_s1 = inlined_call_operand.vmem [shape: f32[32,32], index: 1, kind: input, shape index: {}]   ;;  %s192_s0 = inlined_call_operand.vmem [shape: f32[16,32], index: 0, kind: input, shape index: {}]   ;;  %s193_s2 = inlined_call_operand.vmem [shape: f32[16,32], index: 2, kind: output, shape index: {}]  }
   0x1   :  { %v25_v0 = vld [vmem:[%s191_s1 + $0x18] sm:$0xff]  ;;  %v24_v1 = vld [vmem:[%s191_s1 + $0x10] sm:$0xff]  ;;  %17 = vst.msk [vmem:[#allocation2 + $0x8] sm:$0xff] %vm15_vm0, %v143_v2  ;;  %16 = vst.msk [vmem:[#allocation2] sm:$0xff] %vm15_vm0, %v143_v2 }
   0x2   :  { %131 = vmatprep.subr.mxu0 %v25_v0  ;;  %v20_v3 = vld [vmem:[%s192_s0] sm:$0xff]  ;;  %v23_v4 = vld [vmem:[%s191_s1 + $0x8] sm:$0xff] }
   0x3   :  { %132 = vmatpush3.msra.mxu0 %v25_v0  ;;  %139 = vmatprep.mubr.msk.f32.mxu0 %vm15_vm0, %v20_v3  ;;  %v22_v5 = vld [vmem:[%s191_s1] sm:$0xff]  ;;  %v21_v6 = vld [vmem:[%s192_s0 + $0x8] sm:$0xff] }
   0x4   :  { %133 = vmatprep.subr.mxu0 %v24_v1 }
   0x5   :  { %134 = vmatpush3.msra.mxu0 %v24_v1 }
   0x6   :  { %135 = vmatprep.subr.mxu0 %v23_v4 }
   0x7   :  { %136 = vmatpush3.msra.mxu0 %v23_v4 }
   0x8   :  { %137 = vmatprep.subr.mxu0 %v22_v5  ;;  %v19_v7 = vld [vmem:[#allocation2 + $0x8] sm:$0xff]  ;;  %v18_v9 = vld [vmem:[#allocation2] sm:$0xff] }
   0x9   :  { %138 = vmatpush3.msra.mxu0 %v22_v5 }
   0xa   :  { %140 = vmatmul.mubr.msk.f32.vlgmr.msra.gmra.mxu0 %vm15_vm0, %v21_v6 }
  0xca   :  { %v141_v8 = vpop.f32.mrf.mxu0 }
  0xcb   :  { %v109_v10 = vadd.f32 %v141_v8, %v19_v7 }
  0xcc   :  { %v99_v11 = vpop.f32.mrf.mxu0 }
  0xcd   :  { %111 = vst.msk [vmem:[#allocation2 + $0x8] sm:$0xff] %vm15_vm0, %v109_v10  ;;  %v108_v12 = vadd.f32 %v99_v11, %v18_v9 }
  0xcf   :  { %110 = vst.msk [vmem:[#allocation2] sm:$0xff] %vm15_vm0, %v108_v12 }
  0xd4   :  { %v116_v13 = vld [vmem:[#allocation2 + $0x8] sm:$0xff] }
  0xd5   :  { %118 = vst.msk [vmem:[%s193_s2 + $0x8] sm:$0xff] %vm15_vm0, %v116_v13 }
  0xd6   :  { %v115_v14 = vld [vmem:[#allocation2] sm:$0xff] }
  0xd7   :  { %117 = vst.msk [vmem:[%s193_s2] sm:$0xff] %vm15_vm0, %v115_v14 }

// kernel: gqa_forward.8
= control target key start
LH: loop header
LB: loop body
LE: loop exit
PB: predicated region body
PF: predicated region fallthrough
CT: control target
= control target key end

     0   :  { %s939_s12 = smov 0   ;;  %s941_s13 = smov 0   ;;  %s1034_s0 = inlined_call_operand.vmem [shape: f32[2,2,2,8,8], index: 0, kind: input, shape index: {}]   ;;  %s1035_s1 = inlined_call_operand.vmem [shape: f32[2,2,8,8], index: 1, kind: input, shape index: {}]   ;;  %s1036_s2 = inlined_call_operand.vmem [shape: f32[2,2,8,8], index: 2, kind: input, shape index: {}]   ;;  %s1037_s3 = inlined_call_operand.vmem [shape: f32[2,2,2,8,8], index: 3, kind: output, shape index: {}]  }
   0x1   :  { %s943_s14 = smov 0   ;;  %s945_s15 = smov 0  }
   0x2   :  { %s947_s16 = smov 0  }
   0x3 LB: > { %s35_s17 = sadd.s32 1, %s906_s14  ;;  %s39_s18 = sadd.s32 1, %s910_s15  ;;  %s914_s16 = sphi %s947_s16, %s13_s16   ;;  %s910_s15 = sphi %s945_s15, %s1041_s15   ;;  %s906_s14 = sphi %s943_s14, %s1040_s14   ;;  %s902_s13 = sphi %s941_s13, %s1039_s13   ;;  %s898_s12 = sphi %s939_s12, %s1038_s12  }
   0x4   : > { %p37_p0 = scmp.ge.s32.totalorder %s35_s17, 2  ;;  %p785_p1 = scmp.ge.s32.totalorder %s914_s16, 1 }
   0x5   : > { %p218_p2 = scmp.lt.s32.totalorder %s914_s16, 5 }
   0x6   : > { %s1043_s17 = smov (%p37_p0, %s35_s17), 0  ;;  %s1045_s18 = smov (!%p37_p0, %s39_s18), %s910_s15 }
   0x7   : > { %p219_p3 = pnand %p785_p1, %p218_p2  ;;  %p41_p4 = scmp.ge.s32.totalorder %s1045_s18, 2 }
   0x8   : > { %p278_p5 = scmp.lt.s32.totalorder (!%p219_p3), %s902_s13, 1  ;;  %p280_p6 = scmp.lt.s32.totalorder (!%p219_p3), %s898_s12, 1 }
   0x9   : > { %s1047_s18 = smov (%p41_p4, %s1045_s18), 0  ;;  %222 = sbr.rel (%p219_p3) target bundleno = 801 (0x321), region = 32 }
   0xe   : > { %s1049_s13 = smov (!%p278_p5, %s902_s13), 1  ;;  %s1051_s12 = smov (!%p280_p6, %s898_s12), 1  ;;  %vm333_vm0 = vcmask 64512   ;;  %vm328_vm1 = vcmask 7168   ;;  %v916_v5 = vmov -inf   ;;  %v434_v6 = vlaneseq }
   0xf   : > { %s789_s19 = sshll.u32 %s1049_s13, 1  ;;  %s787_s20 = sshll.u32 %s1049_s13, 2  ;;  %329 = vst.msk [vmem:[#allocation2] sm:$0xff] %vm328_vm1, %v916_v5  ;;  %330 = vst.msk [vmem:[#allocation2 + $0x8] sm:$0xff] %vm328_vm1, %v916_v5  ;;  %v917_v15 = vmov 0   ;;  %v918_v16 = vmov 0.0  }
  0x10   : > { %s969_s21 = sadd.s32 %s789_s19, %s1051_s12  ;;  %s786_s22 = sshll.u32 %s1051_s12, 1  ;;  %v435_v7 = vshrl.u32 %v434_v6, 7  ;;  %v439_v8 = vand.u32 127, %v434_v6  ;;  %862 = vset.pattern.permute.xlu1 %v917_v15  ;;  %863 = vset.pattern.permute.xlu0 %v917_v15  ;;  %331 = vst.msk [vmem:[#allocation3] sm:$0xff] %vm328_vm1, %v918_v16  ;;  %332 = vst.msk [vmem:[#allocation3 + $0x8] sm:$0xff] %vm328_vm1, %v918_v16 }
  0x11   : > { %s790_s23 = sshll.u32 %s969_s21, 3  ;;  %s972_s24 = sadd.s32 %s787_s20, %s786_s22  ;;  %334 = vst.msk [vmem:[#allocation4] sm:$0xff] %vm333_vm0, %v918_v16  ;;  %335 = vst.msk [vmem:[#allocation4 + $0x8] sm:$0xff] %vm333_vm0, %v918_v16 }
  0x12   : > { %s300_s27 = scalar_lea.vmem %s1035_s1, %s790_s23  ;;  %s788_s28 = sshll.u32 %s972_s24, 3  ;;  %vm442_vm2 = vcmp.ge.s32.totalorder %v435_v7, %v439_v8 }
  0x13   : > { %v345_v0 = vld [vmem:[%s300_s27] sm:$0xff]  ;;  %s289_s4 = scalar_lea.vmem %s1034_s0, %s788_s28  ;;  %s311_s7 = scalar_lea.vmem %s1036_s2, %s790_s23 }
  0x14   : > { %809 = vmatprep.subr.msk.mxu0 %vm333_vm0, %v345_v0  ;;  %v343_v1 = vld [vmem:[%s289_s4] sm:$0xff]  ;;  %v344_v2 = vld [vmem:[%s289_s4 + $0x8] sm:$0xff]  ;;  %s323_s10 = scalar_lea.vmem %s1037_s3, %s788_s28 }
  0x15   : > { %810 = vmatpush3.xpose.msk.msra.mxu0 %vm333_vm0, %v345_v0  ;;  %v347_v3 = vmul.f32 0.35355338, %v343_v1  ;;  %v348_v4 = vmul.f32 0.35355338, %v344_v2  ;;  %v346_v27 = vld [vmem:[%s311_s7] sm:$0xff] }
  0x16   : > { %v449_v17 = vld [vmem:[#allocation2] sm:$0xff]  ;;  %v450_v20 = vld [vmem:[#allocation2 + $0x8] sm:$0xff]  ;;  %814 = vmatprep.subr.mxu1 %v346_v27 }
  0x17   : > { %811 = vmatprep.mubr.msk.f32.mxu0 %vm333_vm0, %v347_v3  ;;  %815 = vmatpush3.msra.mxu1 %v346_v27  ;;  %v485_v42 = vld [vmem:[#allocation3] sm:$0xff]  ;;  %v486_v45 = vld [vmem:[#allocation3 + $0x8] sm:$0xff] }
  0x18   : > { %812 = vmatmul.mubr.msk.f32.vlgmr.msra.gmra.mxu0 %vm333_vm0, %v348_v4  ;;  %v582_v54 = vld [vmem:[#allocation4 + $0x8] sm:$0xff]  ;;  %v581_v56 = vld [vmem:[#allocation4] sm:$0xff] }
  0xd8   : > { %v813_v9 = vpop.f32.mrf.mxu0 }
  0xd9   : > { %vm444_vm3 = vcmp.ne.f32.partialorder %v813_v9, 0.0 }
  0xda   : > { %v425_v10 = vpop.f32.mrf.mxu0  ;;  %vm446_vm5 = vmand %vm442_vm2, %vm444_vm3 }
  0xdb   : > { %vm443_vm4 = vcmp.ne.f32.partialorder %v425_v10, 0.0  ;;  %v448_v13 = vsel %vm446_vm5, %v813_v9, -inf }
  0xdc   : > { %vm445_vm6 = vmand %vm442_vm2, %vm443_vm4  ;;  %v454_v14 = vsel %vm333_vm0, %v448_v13, -inf }
  0xdd   : > { %v447_v11 = vsel %vm445_vm6, %v425_v10, -inf }
  0xde   : > { %v451_v12 = vsel %vm333_vm0, %v447_v11, -inf }
  0xdf   : > { %452 = vmax.xlane.f32.xlu0 %v451_v12 }
  0xe3   : > { %455 = vmax.xlane.f32.xlu0 %v454_v14 }
 0x168   : > { %v453_v18 = vpop.xlane.xlu0 %452 }
 0x169   : > { %v457_v19 = vmax.f32 %v449_v17, %v453_v18 }
 0x16b   : > { %599 = vst.msk [vmem:[#allocation2] sm:$0xff] %vm328_vm1, %v457_v19  ;;  %vm459_vm7 = vcmp.eq.f32.partialorder %v457_v19, -inf }
 0x16c   : > { %v456_v21 = vpop.xlane.xlu0 %455  ;;  %v461_v22 = vsel %vm459_vm7, 0.0, %v457_v19 }
 0x16d   : > { %v458_v23 = vmax.f32 %v450_v20, %v456_v21  ;;  %471 = vperm.xlu1 %862, %v461_v22   ;;  %v463_v24 = vsub.f32 %v449_v17, %v461_v22 }
 0x16f   : > { %600 = vst.msk [vmem:[#allocation2 + $0x8] sm:$0xff] %vm328_vm1, %v458_v23  ;;  %vm460_vm8 = vcmp.eq.f32.partialorder %v458_v23, -inf  ;;  %v465_v39 = vmul.f32 1.442695, %v463_v24 }
 0x170   : > { %v462_v25 = vsel %vm460_vm8, 0.0, %v458_v23 }
 0x171   : > { %476 = vperm.xlu1 %862, %v462_v25   ;;  %v464_v26 = vsub.f32 %v450_v20, %v462_v25 }
 0x173   : > { %v467_v37 = vmul.f32 1.442695, %v464_v26 }
 0x1e8   : > { %v472_v28 = vpop.permute.xlu1 %471 }
 0x1e9   : > { %v479_v29 = vsub.f32 %v447_v11, %v472_v28 }
 0x1eb   : > { %v481_v30 = vmul.f32 1.442695, %v479_v29 }
 0x1ec   : > { %v477_v31 = vpop.permute.xlu1 %476 }
 0x1ed   : > { %864 = vpow2.f32 %v481_v30  ;;  %v480_v32 = vsub.f32 %v448_v13, %v477_v31 }
 0x1ef   : > { %v483_v33 = vmul.f32 1.442695, %v480_v32 }
 0x1f1   : > { %866 = vpow2.f32 %v483_v33 }
 0x1f2   : > { %868 = vpow2.f32 %v467_v37 }
 0x1f3   : > { %870 = vpow2.f32 %v465_v39 }
 0x1fa   : > { %v865_v34 = vpop.eup %864 }
 0x1fb   : > { %816 = vmatprep.mubr.msk.f32.mxu1 %vm333_vm0, %v865_v34  ;;  %v489_v35 = vsel %vm333_vm0, %v865_v34, 0.0 }
 0x1fc   : > { %490 = vadd.xlane.f32.xlu0 %v489_v35 }
 0x1fe   : > { %v867_v36 = vpop.eup %866 }
 0x1ff   : > { %817 = vmatmul.mubr.msk.f32.vlgmr.msra.gmra.mxu1 %vm333_vm0, %v867_v36  ;;  %v492_v38 = vsel %vm333_vm0, %v867_v36, 0.0  ;;  %v869_v40 = vpop.eup %868 }
 0x200   : > { %493 = vadd.xlane.f32.xlu1 %v492_v38  ;;  %v871_v41 = vpop.eup %870  ;;  %v488_v47 = vmul.f32 %v869_v40, %v486_v45 }
 0x201   : > { %v487_v43 = vmul.f32 %v871_v41, %v485_v42 }
 0x211   : > { %590 = vperm.xlu1 %862, %v869_v40  }
 0x212   : > { %585 = vperm.xlu0 %863, %v871_v41  }
 0x285   : > { %v491_v44 = vpop.xlane.xlu0 %490 }
 0x286   : > { %v495_v46 = vadd.f32 %v491_v44, %v487_v43 }
 0x288   : > { %498 = vst.msk [vmem:[#allocation3] sm:$0xff] %vm328_vm1, %v495_v46 }
 0x289   : > { %v494_v48 = vpop.xlane.xlu1 %493 }
 0x28a   : > { %v496_v49 = vadd.f32 %v494_v48, %v488_v47 }
 0x28c   : > { %499 = vst.msk [vmem:[#allocation3 + $0x8] sm:$0xff] %vm328_vm1, %v496_v49 }
 0x28d   : > { %v591_v55 = vpop.permute.xlu1 %590  ;;  %v586_v57 = vpop.permute.xlu0 %585 }
 0x28e   : > { %v594_v58 = vmul.f32 %v591_v55, %v582_v54  ;;  %v593_v60 = vmul.f32 %v586_v57, %v581_v56 }
 0x28f   : > { %v604_v50 = vld [vmem:[#allocation3] sm:$0xff] }
 0x290   : > { %872 = vrcp.f32 %v604_v50 }
 0x293   : > { %v605_v51 = vld [vmem:[#allocation3 + $0x8] sm:$0xff] }
 0x294   : > { %874 = vrcp.f32 %v605_v51 }
 0x29d   : > { %v873_v52 = vpop.eup %872 }
 0x29e   : > { %612 = vperm.xlu0 %863, %v873_v52  }
 0x2a1   : > { %v875_v53 = vpop.eup %874 }
 0x2a2   : > { %617 = vperm.xlu0 %863, %v875_v53  }
 0x2bf   : > { %v818_v59 = vpop.f32.mrf.mxu1 }
 0x2c0   : > { %v596_v61 = vadd.f32 %v818_v59, %v594_v58 }
 0x2c1   : > { %v572_v62 = vpop.f32.mrf.mxu1 }
 0x2c2   : > { %598 = vst.msk [vmem:[#allocation4 + $0x8] sm:$0xff] %vm333_vm0, %v596_v61  ;;  %v595_v63 = vadd.f32 %v593_v60, %v572_v62 }
 0x2c4   : > { %597 = vst.msk [vmem:[#allocation4] sm:$0xff] %vm333_vm0, %v595_v63 }
 0x2c9   : > { %v609_v3 = vld [vmem:[#allocation4 + $0x8] sm:$0xff] }
 0x2cb   : > { %v608_v0 = vld [vmem:[#allocation4] sm:$0xff] }
 0x319   : > { %v613_v1 = vpop.permute.xlu0 %612 }
 0x31a   : > { %v620_v2 = vmul.f32 %v613_v1, %v608_v0 }
 0x31c   : > { %623 = vst.msk [vmem:[%s323_s10] sm:$0xff] %vm333_vm0, %v620_v2 }
 0x31d   : > { %v618_v4 = vpop.permute.xlu0 %617 }
 0x31e   : > { %v621_v5 = vmul.f32 %v618_v4, %v609_v3 }
 0x320   : > { %624 = vst.msk [vmem:[%s323_s10 + $0x8] sm:$0xff] %vm333_vm0, %v621_v5 }
 0x321 PF: > { %s13_s16 = sadd.s32 1, %s914_s16   ;;  %s1038_s12 = smov %s906_s14 }
 0x322   : > { %p10_p7 = scmp.ge.s32.totalorder %s13_s16, 6   ;;  %s1039_s13 = smov %s910_s15 }
 0x323   : > { %s1040_s14 = smov %s1043_s17  ;;  %s1041_s15 = smov %s1047_s18 }
 0x324   :  { %12 = sbr.rel (!%p10_p7) target bundleno = 3 (0x3), region = 80 }

// kernel: gqa_forward.9
= control target key start
LH: loop header
LB: loop body
LE: loop exit
PB: predicated region body
PF: predicated region fallthrough
CT: control target
= control target key end

     0   :  { %vm16_vm0 = vcmask 261120   ;;  %v181_v3 = vmov 0.0   ;;  %s229_s0 = inlined_call_operand.vmem [shape: f32[16,32], index: 0, kind: input, shape index: {}]   ;;  %s230_s1 = inlined_call_operand.vmem [shape: f32[32,32], index: 1, kind: input, shape index: {}]   ;;  %s231_s2 = inlined_call_operand.hbm [shape: f32[16,32], index: 2, kind: output, shape index: {}]  }
   0x1   :  { %v26_v0 = vld [vmem:[%s230_s1 + $0x18] sm:$0xff]  ;;  %v25_v1 = vld [vmem:[%s230_s1 + $0x10] sm:$0xff]  ;;  %v21_v2 = vld [vmem:[%s229_s0] sm:$0xff]  ;;  %18 = vst.msk [vmem:[#allocation2 + $0x8] sm:$0xff] %vm16_vm0, %v181_v3 }
   0x2   :  { %144 = vmatprep.subr.mxu0 %v26_v0  ;;  %17 = vst.msk [vmem:[#allocation2] sm:$0xff] %vm16_vm0, %v181_v3  ;;  %v24_v4 = vld [vmem:[%s230_s1 + $0x8] sm:$0xff]  ;;  %152 = vmatprep.mubr.msk.f32.mxu0 %vm16_vm0, %v21_v2 }
   0x3   :  { %145 = vmatpush3.msra.mxu0 %v26_v0 }
   0x4   :  { %7 = vsyncpa [#allocation4], 0  ;;  %146 = vmatprep.subr.mxu0 %v25_v1  ;;  %v23_v5 = vld [vmem:[%s230_s1] sm:$0xff]  ;;  %v22_v6 = vld [vmem:[%s229_s0 + $0x8] sm:$0xff]  ;;  %s182_s1 = smov [#allocation3]  }
   0x5   :  { %147 = vmatpush3.msra.mxu0 %v25_v1  ;;  %s125_s21 = sshll.u32 %s182_s1, 4  ;;  %s126_s21 = int_to_ptr.vmem [resolvable:$true] %s125_s21 }
   0x6   :  { %148 = vmatprep.subr.mxu0 %v24_v4  ;;  %s159_s0 = scalar_lea.vmem %s126_s21, 256  ;;  %p164_p1 = scmp.lt.s32.totalorder %s126_s21, %s126_s21 }
   0x7   :  { %149 = vmatpush3.msra.mxu0 %v24_v4  ;;  %p160_p0 = scmp.ne.s32.totalorder %s126_s21, %s159_s0  ;;  %p165_p2 = scmp.lt.s32.totalorder %s159_s0, %s159_s0 }
   0x8   :  { %150 = vmatprep.subr.mxu0 %v23_v5  ;;  %v20_v7 = vld [vmem:[#allocation2 + $0x8] sm:$0xff] }
   0x9   :  { %151 = vmatpush3.msra.mxu0 %v23_v5  ;;  %v19_v9 = vld [vmem:[#allocation2] sm:$0xff]  ;;  %p166_p3 = por %p165_p2, %p164_p1 }
   0xa   :  { %153 = vmatmul.mubr.msk.f32.vlgmr.msra.gmra.mxu0 %vm16_vm0, %v22_v6 }
   0xb   :  { %p167_p4 = pnand %p166_p3, %p160_p0 }
  0xca   :  { %v154_v8 = vpop.f32.mrf.mxu0 }
  0xcb   :  { %v110_v10 = vadd.f32 %v154_v8, %v20_v7 }
  0xcc   :  { %v100_v11 = vpop.f32.mrf.mxu0 }
  0xcd   :  { %112 = vst.msk [vmem:[#allocation2 + $0x8] sm:$0xff] %vm16_vm0, %v110_v10  ;;  %v109_v12 = vadd.f32 %v100_v11, %v19_v9 }
  0xcf   :  { %111 = vst.msk [vmem:[#allocation2] sm:$0xff] %vm16_vm0, %v109_v12 }
  0xd4   :  { %v117_v13 = vld [vmem:[#allocation2 + $0x8] sm:$0xff] }
  0xd5   :  { %119 = vst.msk [vmem:[#allocation3 + $0x8] sm:$0xff] %vm16_vm0, %v117_v13 }
  0xd6   :  { %v116_v14 = vld [vmem:[#allocation2] sm:$0xff] }
  0xd7   :  { %118 = vst.msk [vmem:[#allocation3] sm:$0xff] %vm16_vm0, %v116_v14 }
  0xd8   :  { %170 = shalt.err (!%p167_p4)
}
  0xd9   :  { %s183_s22 = smov 128   ;;  %s184_s23 = smov 8  }
  0xda   :  { %131 = dma.vmem_to_hbm [thread:$0]  %s126_s21, 256, %s231_s2, [#allocation4], %s183_s22, %s183_s22, %s184_s23  }
  0xdb   :  { %179 = dma.done.wait [#allocation4], 256  }
  0xdc   :  { %180 = vsyncadd [#allocation4], 4294967040 }
  0xdd   :  { %135 = vsyncpa [#allocation4], 1 }

</bundles_post_ra>
